<compile_context>
chip_gen: v7x
topology: tpu7x:2x2x1
jax: 0.10.0
libtpu: 0.0.40
codegen_flags: <defaults>
</compile_context>

<pallas_src>
import functools

import jax
import jax.numpy as jnp
from jax.experimental import pallas as pl
from jax.experimental.pallas import tpu as pltpu


# ----------------------------- model sizes -----------------------------

STEM_C, MID_C, FEAT_C = 32, 16, 64   # FEAT_C plays the role of resnet.fc.in_features
CP = 128                             # lane-dense padded channel width (layer outputs)
BP = 8                               # batch rows padded to one sublane group (B <= 8)
TM_TARGET = 1024                     # row tile (multiple of 8)
VMEM_LIMIT = 48 * 1024 * 1024        # sized for v7x's 64 MiB physical VMEM


def _round_up(x, m):
    return (x + m - 1) // m * m


# ----------------------------- Pallas kernels -----------------------------

def _stem_c1_kernel(p_ref, sw_ref, c1w_ref, b_ref, x_ref, y1_ref):
    """x = relu(patches @ stem_w + b[0]); y1 = relu(x @ c1_w + b[1]).  bf16 MXU, f32 acc."""
    x = jnp.dot(p_ref[...], sw_ref[...], preferred_element_type=jnp.float32)
    x = jnp.maximum(x + b_ref[0:1, :], 0.0)
    y1 = jnp.dot(x.astype(c1w_ref.dtype), c1w_ref[...],
                 preferred_element_type=jnp.float32)
    y1 = jnp.maximum(y1 + b_ref[1:2, :], 0.0)
    x_ref[...] = x.astype(x_ref.dtype)
    y1_ref[...] = y1.astype(y1_ref.dtype)


def _tail_kernel(x_ref, p2_ref, c2w_ref, c3w_ref, dsw_ref, b_ref, part_ref,
                 *, hw, m_rows):
    """c2(3x3 im2col) -> c3(1x1) + 1x1-downsample residual -> ReLU -> per-tile pool sum.

    Writes one [BP, CP] f32 partial pool sum per row tile (no cross-step state), so the
    grid axis is truly parallel (v7x megacore-friendly).  Pool weights are exactly 1.0
    in bf16; the 1/HW scale is applied later in f32.  Padding rows (>= m_rows), which
    contain relu(bias) garbage, are zero-weighted by the in-kernel mask.
    """
    step = pl.program_id(0)
    tm = x_ref.shape[0]

    y2 = jnp.dot(p2_ref[...], c2w_ref[...], preferred_element_type=jnp.float32)
    y2 = jnp.maximum(y2 + b_ref[0:1, :], 0.0)

    ds = jnp.dot(x_ref[...], dsw_ref[...], preferred_element_type=jnp.float32)
    ds = ds + b_ref[2:3, :]

    y3 = jnp.dot(y2.astype(c3w_ref.dtype), c3w_ref[...],
                 preferred_element_type=jnp.float32)
    y3 = jnp.maximum(y3 + b_ref[1:2, :] + ds, 0.0)

    # In-kernel pool mask: row r belongs to batch b iff b*HW <= r < (b+1)*HW.
    # Multiply/compare only (no integer division), generated on the VPU (has slack).
    row = jax.lax.broadcasted_iota(jnp.int32, (BP, tm), 1) + step * tm
    brow = jax.lax.broadcasted_iota(jnp.int32, (BP, tm), 0)
    mask = (row >= brow * hw) & (row < (brow + 1) * hw) & (row < m_rows)
    pool = jnp.where(mask, 1.0, 0.0).astype(jnp.bfloat16)       # weights 1.0, exact
    part_ref[...] = jnp.dot(pool, y3.astype(jnp.bfloat16),
                            preferred_element_type=jnp.float32)


def _finalize_kernel(part_ref, ew_ref, eb_ref, out_ref, *, inv_hw):
    """Sum per-tile pool partials, scale by 1/HW in f32, then embed matmul + bias."""
    feats = jnp.sum(part_ref[...], axis=0) * inv_hw             # [BP, CP] f32
    emb = jnp.dot(feats.astype(ew_ref.dtype), ew_ref[...],
                  preferred_element_type=jnp.float32) + eb_ref[...]
    out_ref[...] = emb.astype(out_ref.dtype)


# ----------------------------- Pallas wrappers -----------------------------

def stem_c1_call(patches, stem_w, c1_w, biases, tm):
    Mp, K0P = patches.shape
    grid = (Mp // tm,)
    full = lambda i: (0, 0)
    rows = lambda i: (i, 0)
    return pl.pallas_call(
        _stem_c1_kernel,
        grid=grid,
        in_specs=[
            pl.BlockSpec((tm, K0P), rows),    # im2col'd stem patches
            pl.BlockSpec((K0P, CP), full),    # stem weight
            pl.BlockSpec((CP, CP), full),     # c1 weight
            pl.BlockSpec((BP, CP), full),     # packed biases (stem, c1)
        ],
        out_specs=[
            pl.BlockSpec((tm, CP), rows),
            pl.BlockSpec((tm, CP), rows),
        ],
        out_shape=(
            jax.ShapeDtypeStruct((Mp, CP), jnp.bfloat16),
            jax.ShapeDtypeStruct((Mp, CP), jnp.bfloat16),
        ),
        compiler_params=pltpu.CompilerParams(
            dimension_semantics=("parallel",),
            vmem_limit_bytes=VMEM_LIMIT),
    )(patches, stem_w, c1_w, biases)


def tail_call(x, p2, c2w, c3w, dsw, biases, tm, hw, m_rows):
    Mp, _ = x.shape
    K2P = p2.shape[1]
    nt = Mp // tm
    full = lambda i: (0, 0)
    rows = lambda i: (i, 0)
    return pl.pallas_call(
        functools.partial(_tail_kernel, hw=hw, m_rows=m_rows),
        grid=(nt,),
        in_specs=[
            pl.BlockSpec((tm, CP), rows),     # x (stem output, residual path)
            pl.BlockSpec((tm, K2P), rows),    # im2col(c1 out), K2P = 9*MID_C padded
            pl.BlockSpec((K2P, CP), full),    # c2 weight
            pl.BlockSpec((CP, CP), full),     # c3 weight
            pl.BlockSpec((CP, CP), full),     # downsample weight
            pl.BlockSpec((BP, CP), full),     # packed biases (c2, c3, ds)
        ],
        out_specs=pl.BlockSpec((None, BP, CP), lambda i: (i, 0, 0)),
        out_shape=jax.ShapeDtypeStruct((nt, BP, CP), jnp.float32),
        compiler_params=pltpu.CompilerParams(
            dimension_semantics=("parallel",),  # no cross-step state -> v7x can shard
            vmem_limit_bytes=VMEM_LIMIT),
    )(x, p2, c2w, c3w, dsw, biases)


def finalize_call(partials, ew, eb, hw):
    nt = partials.shape[0]
    return pl.pallas_call(
        functools.partial(_finalize_kernel, inv_hw=1.0 / hw),
        grid=(1,),
        in_specs=[
            pl.BlockSpec((nt, BP, CP), lambda i: (0, 0, 0)),
            pl.BlockSpec((CP, CP), lambda i: (0, 0)),
            pl.BlockSpec((1, CP), lambda i: (0, 0)),
        ],
        out_specs=pl.BlockSpec((BP, CP), lambda i: (0, 0)),
        out_shape=jax.ShapeDtypeStruct((BP, CP), jnp.float32),
        compiler_params=pltpu.CompilerParams(vmem_limit_bytes=VMEM_LIMIT),
    )(partials, ew, eb)


# ----------------------------- host-side glue -----------------------------

def im2col_nhwc(x, kh, kw, stride, pad):
    """x: [B, H, W, C] -> patches [B*Ho*Wo, kh*kw*C] (kernel-position outer, C inner)."""
    B, H, W, C = x.shape
    xp = jnp.pad(x, ((0, 0), (pad, pad), (pad, pad), (0, 0)))
    Ho = (H + 2 * pad - kh) // stride + 1
    Wo = (W + 2 * pad - kw) // stride + 1
    cols = []
    for i in range(kh):
        for j in range(kw):
            cols.append(xp[:, i:i + stride * Ho:stride, j:j + stride * Wo:stride, :])
    cols = jnp.concatenate(cols, axis=-1)            # [B, Ho, Wo, kh*kw*C]
    return cols.reshape(B * Ho * Wo, kh * kw * C), Ho, Wo


def conv_w_to_mat(w, cout_p, cin_p):
    """OIHW conv weight -> [kh*kw*cin_p, cout_p] matmul weight, zero-padded."""
    Cout, Cin, kh, kw = w.shape
    wp = jnp.zeros((cout_p, cin_p, kh, kw), w.dtype).at[:Cout, :Cin].set(w)
    return wp.transpose(2, 3, 1, 0).reshape(kh * kw * cin_p, cout_p)


def pack_biases(bias_list):
    """Pack several small bias vectors into one (BP, CP) f32 array, one per row."""
    out = jnp.zeros((BP, CP), jnp.float32)
    for r, b in enumerate(bias_list):
        out = out.at[r, :b.shape[0]].set(b.astype(jnp.float32))
    return out


# ----------------------------- model -----------------------------

def init_params(key, embed_size):
    ks = jax.random.split(key, 12)
    w = lambda k, shape, s: (jax.random.normal(k, shape, jnp.float32) * s)
    return {
        "stem_w": w(ks[0], (STEM_C, 3, 3, 3), 0.1),    "stem_b": w(ks[1], (STEM_C,), 0.01),
        "c1_w":  w(ks[2], (MID_C, STEM_C, 1, 1), 0.1), "c1_b":  w(ks[3], (MID_C,), 0.01),
        "c2_w":  w(ks[4], (MID_C, MID_C, 3, 3), 0.1),  "c2_b":  w(ks[5], (MID_C,), 0.01),
        "c3_w":  w(ks[6], (FEAT_C, MID_C, 1, 1), 0.1), "c3_b":  w(ks[7], (FEAT_C,), 0.01),
        "ds_w":  w(ks[8], (FEAT_C, STEM_C, 1, 1), 0.1), "ds_b": w(ks[9], (FEAT_C,), 0.01),
        "embed_w": w(ks[10], (embed_size, FEAT_C), 0.1),   # torch.nn.Linear: [out, in]
        "embed_b": w(ks[11], (embed_size,), 0.01),
    }


def encoder_cnn_forward(params, images):
    # images: [B, 3, H, W] (NCHW, PyTorch convention) -> NHWC once, then [rows, C].
    B = images.shape[0]
    embed_size = params["embed_b"].shape[0]
    assert B <= BP, f"batch {B} exceeds BP={BP}"
    assert embed_size <= CP, f"embed_size {embed_size} exceeds CP={CP}"
    x_nhwc = images.transpose(0, 2, 3, 1)

    # ---- stem im2col (host glue) ----
    patches, Ho, Wo = im2col_nhwc(x_nhwc, 3, 3, stride=2, pad=1)   # [M, 27]
    M, K0 = B * Ho * Wo, patches.shape[1]
    HW = Ho * Wo
    tm = min(TM_TARGET, _round_up(M, 8))
    Mp = _round_up(M, tm)
    K0P = _round_up(K0, 8)
    patches = jnp.pad(patches, ((0, Mp - M), (0, K0P - K0))).astype(jnp.bfloat16)

    # ---- weights: lane-dense outputs (padded to 128), bf16 operands ----
    stem_w = jnp.pad(conv_w_to_mat(params["stem_w"], CP, 3),
                     ((0, K0P - K0), (0, 0))).astype(jnp.bfloat16)
    c1_w = conv_w_to_mat(params["c1_w"], CP, CP).astype(jnp.bfloat16)
    # c2 contraction uses the REAL c1 channel count (MID_C) -> K2 = 9*16 = 144,
    # padded to a 128-multiple (256) instead of the previous 9*128 = 1152.
    c2_core = conv_w_to_mat(params["c2_w"], CP, MID_C)             # [9*MID_C, CP]
    K2 = c2_core.shape[0]
    K2P = _round_up(K2, 128)
    c2_w = jnp.pad(c2_core, ((0, K2P - K2), (0, 0))).astype(jnp.bfloat16)
    c3_w = conv_w_to_mat(params["c3_w"], CP, CP).astype(jnp.bfloat16)
    ds_w = conv_w_to_mat(params["ds_w"], CP, CP).astype(jnp.bfloat16)
    ew = jnp.zeros((CP, CP), jnp.float32).at[:FEAT_C, :embed_size].set(
        params["embed_w"].T).astype(jnp.bfloat16)

    stem_biases = pack_biases([params["stem_b"], params["c1_b"]])
    tail_biases = pack_biases([params["c2_b"], params["c3_b"], params["ds_b"]])
    eb = jnp.zeros((1, CP), jnp.float32).at[0, :embed_size].set(params["embed_b"])

    # ---- kernel A: stem + c1 (fused, row tiles parallel) ----
    x, y1 = stem_c1_call(patches, stem_w, c1_w, stem_biases, tm)

    # ---- host glue: im2col for the 3x3 conv c2 over c1's REAL channels only ----
    y1_sp = y1[:M, :MID_C].reshape(B, Ho, Wo, MID_C)
    p2, _, _ = im2col_nhwc(y1_sp, 3, 3, stride=1, pad=1)           # [M, 9*MID_C] bf16
    p2 = jnp.pad(p2, ((0, Mp - M), (0, K2P - K2)))

    # ---- kernel B: c2 + c3 + downsample residual + ReLU + per-tile pool partials ----
    partials = tail_call(x, p2, c2_w, c3_w, ds_w, tail_biases, tm, HW, M)

    # ---- kernel C: reduce partials, 1/HW in f32, embed matmul + bias ----
    out_full = finalize_call(partials, ew, eb, HW)
    return out_full[:B, :embed_size]


# ----------------------------- f32 reference -----------------------------

def reference_forward(params, images):
    def conv(x, w, b, stride, pad):
        y = jax.lax.conv_general_dilated(
            x, w, window_strides=(stride, stride),
            padding=[(pad, pad), (pad, pad)],
            dimension_numbers=("NCHW", "OIHW", "NCHW"))
        return y + b.reshape(1, -1, 1, 1)
    x = jnp.maximum(conv(images, params["stem_w"], params["stem_b"], 2, 1), 0.0)
    idn = x
    y = jnp.maximum(conv(x, params["c1_w"], params["c1_b"], 1, 0), 0.0)
    y = jnp.maximum(conv(y, params["c2_w"], params["c2_b"], 1, 1), 0.0)
    ds = conv(idn, params["ds_w"], params["ds_b"], 1, 0)
    y = jnp.maximum(conv(y, params["c3_w"], params["c3_b"], 1, 0) + ds, 0.0)
    feats = jnp.mean(y, axis=(2, 3))
    return feats @ params["embed_w"].T + params["embed_b"]


if __name__ == "__main__":
    key = jax.random.PRNGKey(0)
    pkey, xkey = jax.random.split(key)
    embed_size = 32
    params = init_params(pkey, embed_size)
    images = jax.random.normal(xkey, (2, 3, 16, 16), jnp.float32)

    fwd = jax.jit(functools.partial(encoder_cnn_forward, params))
    out = jax.block_until_ready(fwd(images))
    assert out.shape == (2, embed_size), out.shape

    ref = reference_forward(params, images)
    # bf16 MXU operands with f32 accumulation: tolerance loosened vs pure-f32 path.
    assert jnp.allclose(out, ref, atol=3e-2, rtol=3e-2), float(jnp.max(jnp.abs(out - ref)))

    print("KERNEL_OK")
</pallas_src>

<mosaic_0001>
module attributes {stable_mosaic.version = 11 : i64} {
  func.func @_stem_c1_kernel(%arg0: i32, %arg1: memref<128x32xbf16, #tpu.memory_space<vmem>>, %arg2: memref<32x128xbf16, #tpu.memory_space<vmem>>, %arg3: memref<128x128xbf16, #tpu.memory_space<vmem>>, %arg4: memref<8x128xf32, #tpu.memory_space<vmem>>, %arg5: memref<128x128xbf16, #tpu.memory_space<vmem>>, %arg6: memref<128x128xbf16, #tpu.memory_space<vmem>>) attributes {dimension_semantics = [#tpu.dimension_semantics<parallel>], iteration_bounds = array<i64: 1>, scalar_prefetch = 0 : i64, scratch_operands = 0 : i64, tpu.core_type = #tpu.core_type<tc>, window_params = [{transform_indices = @transform_0, window_bounds = array<i64: 128, 32>}, {pipeline_mode = #tpu.pipeline_mode<synchronous>, transform_indices = @transform_1, window_bounds = array<i64: 32, 128>}, {pipeline_mode = #tpu.pipeline_mode<synchronous>, transform_indices = @transform_2, window_bounds = array<i64: 128, 128>}, {pipeline_mode = #tpu.pipeline_mode<synchronous>, transform_indices = @transform_3, window_bounds = array<i64: 8, 128>}, {transform_indices = @transform_4, window_bounds = array<i64: 128, 128>}, {transform_indices = @transform_5, window_bounds = array<i64: 128, 128>}]} {
    %c0 = arith.constant 0 : index
    %c0_0 = arith.constant 0 : index
    %0 = vector.load %arg1[%c0, %c0_0] : memref<128x32xbf16, #tpu.memory_space<vmem>>, vector<128x32xbf16>
    %c0_1 = arith.constant 0 : index
    %c0_2 = arith.constant 0 : index
    %1 = vector.load %arg2[%c0_1, %c0_2] : memref<32x128xbf16, #tpu.memory_space<vmem>>, vector<32x128xbf16>
    %cst = arith.constant dense<0.000000e+00> : vector<128x128xf32>
    %2 = tpu.matmul %0, %1, %cst {dimension_numbers = #tpu.dot_dimension_numbers<[1], [0], [0], [1], [0, 0, 1, 1], [], []>} : vector<128x32xbf16>, vector<32x128xbf16>, vector<128x128xf32> -> vector<128x128xf32>
    %c0_3 = arith.constant 0 : index
    %c0_4 = arith.constant 0 : index
    %3 = vector.load %arg4[%c0_3, %c0_4] : memref<8x128xf32, #tpu.memory_space<vmem>>, vector<1x128xf32>
    %4 = vector.broadcast %3 : vector<1x128xf32> to vector<128x128xf32>
    %5 = arith.addf %2, %4 : vector<128x128xf32>
    %cst_5 = arith.constant 0.000000e+00 : f32
    %6 = vector.broadcast %cst_5 : f32 to vector<128x128xf32>
    %7 = arith.maximumf %5, %6 : vector<128x128xf32>
    %8 = arith.truncf %7 : vector<128x128xf32> to vector<128x128xbf16>
    %c0_6 = arith.constant 0 : index
    %c0_7 = arith.constant 0 : index
    %9 = vector.load %arg3[%c0_6, %c0_7] : memref<128x128xbf16, #tpu.memory_space<vmem>>, vector<128x128xbf16>
    %cst_8 = arith.constant dense<0.000000e+00> : vector<128x128xf32>
    %10 = tpu.matmul %8, %9, %cst_8 {dimension_numbers = #tpu.dot_dimension_numbers<[1], [0], [0], [1], [0, 0, 1, 1], [], []>} : vector<128x128xbf16>, vector<128x128xbf16>, vector<128x128xf32> -> vector<128x128xf32>
    %c1 = arith.constant 1 : index
    %c0_9 = arith.constant 0 : index
    %11 = vector.load %arg4[%c1, %c0_9] : memref<8x128xf32, #tpu.memory_space<vmem>>, vector<1x128xf32>
    %12 = vector.broadcast %11 : vector<1x128xf32> to vector<128x128xf32>
    %13 = arith.addf %10, %12 : vector<128x128xf32>
    %cst_10 = arith.constant 0.000000e+00 : f32
    %14 = vector.broadcast %cst_10 : f32 to vector<128x128xf32>
    %15 = arith.maximumf %13, %14 : vector<128x128xf32>
    %16 = arith.truncf %7 : vector<128x128xf32> to vector<128x128xbf16>
    %c0_11 = arith.constant 0 : index
    %c0_12 = arith.constant 0 : index
    %17 = vector.load %arg5[%c0_11, %c0_12] : memref<128x128xbf16, #tpu.memory_space<vmem>>, vector<128x128xbf16>
    tpu.vector_store %arg5[%c0_11, %c0_12], %16 {strides = array<i32>} : memref<128x128xbf16, #tpu.memory_space<vmem>>, vector<128x128xbf16>,
    %18 = arith.truncf %15 : vector<128x128xf32> to vector<128x128xbf16>
    %c0_13 = arith.constant 0 : index
    %c0_14 = arith.constant 0 : index
    %19 = vector.load %arg6[%c0_13, %c0_14] : memref<128x128xbf16, #tpu.memory_space<vmem>>, vector<128x128xbf16>
    tpu.vector_store %arg6[%c0_13, %c0_14], %18 {strides = array<i32>} : memref<128x128xbf16, #tpu.memory_space<vmem>>, vector<128x128xbf16>,
    return
  }
  func.func @transform_0(%arg0: i32) -> (i32, i32) {
    %c0_i32 = arith.constant 0 : i32
    %c0_i32_0 = arith.constant 0 : i32
    return %arg0, %c0_i32 : i32, i32
  }
  func.func @transform_1(%arg0: i32) -> (i32, i32) {
    %c0_i32 = arith.constant 0 : i32
    %c0_i32_0 = arith.constant 0 : i32
    %c0_i32_1 = arith.constant 0 : i32
    return %c0_i32, %c0_i32_0 : i32, i32
  }
  func.func @transform_2(%arg0: i32) -> (i32, i32) {
    %c0_i32 = arith.constant 0 : i32
    %c0_i32_0 = arith.constant 0 : i32
    %c0_i32_1 = arith.constant 0 : i32
    return %c0_i32, %c0_i32_0 : i32, i32
  }
  func.func @transform_3(%arg0: i32) -> (i32, i32) {
    %c0_i32 = arith.constant 0 : i32
    %c0_i32_0 = arith.constant 0 : i32
    %c0_i32_1 = arith.constant 0 : i32
    return %c0_i32, %c0_i32_0 : i32, i32
  }
  func.func @transform_4(%arg0: i32) -> (i32, i32) {
    %c0_i32 = arith.constant 0 : i32
    %c0_i32_0 = arith.constant 0 : i32
    return %arg0, %c0_i32 : i32, i32
  }
  func.func @transform_5(%arg0: i32) -> (i32, i32) {
    %c0_i32 = arith.constant 0 : i32
    %c0_i32_0 = arith.constant 0 : i32
    return %arg0, %c0_i32 : i32, i32
  }
}

module attributes {stable_mosaic.version = 11 : i64} {
  func.func @_tail_kernel(%arg0: i32, %arg1: memref<128x128xbf16, #tpu.memory_space<vmem>>, %arg2: memref<128x256xbf16, #tpu.memory_space<vmem>>, %arg3: memref<256x128xbf16, #tpu.memory_space<vmem>>, %arg4: memref<128x128xbf16, #tpu.memory_space<vmem>>, %arg5: memref<128x128xbf16, #tpu.memory_space<vmem>>, %arg6: memref<8x128xf32, #tpu.memory_space<vmem>>, %arg7: memref<1x8x128xf32, #tpu.memory_space<vmem>>) attributes {dimension_semantics = [#tpu.dimension_semantics<parallel>], iteration_bounds = array<i64: 1>, scalar_prefetch = 0 : i64, scratch_operands = 0 : i64, tpu.core_type = #tpu.core_type<tc>, window_params = [{transform_indices = @transform_0, window_bounds = array<i64: 128, 128>}, {transform_indices = @transform_1, window_bounds = array<i64: 128, 256>}, {pipeline_mode = #tpu.pipeline_mode<synchronous>, transform_indices = @transform_2, window_bounds = array<i64: 256, 128>}, {pipeline_mode = #tpu.pipeline_mode<synchronous>, transform_indices = @transform_3, window_bounds = array<i64: 128, 128>}, {pipeline_mode = #tpu.pipeline_mode<synchronous>, transform_indices = @transform_4, window_bounds = array<i64: 128, 128>}, {pipeline_mode = #tpu.pipeline_mode<synchronous>, transform_indices = @transform_5, window_bounds = array<i64: 8, 128>}, {transform_indices = @transform_6, window_bounds = array<i64: 1, 8, 128>}]} {
    %c0 = arith.constant 0 : index
    %c0_0 = arith.constant 0 : index
    %0 = vector.load %arg2[%c0, %c0_0] : memref<128x256xbf16, #tpu.memory_space<vmem>>, vector<128x256xbf16>
    %c0_1 = arith.constant 0 : index
    %c0_2 = arith.constant 0 : index
    %1 = vector.load %arg3[%c0_1, %c0_2] : memref<256x128xbf16, #tpu.memory_space<vmem>>, vector<256x128xbf16>
    %cst = arith.constant dense<0.000000e+00> : vector<128x128xf32>
    %2 = tpu.matmul %0, %1, %cst {dimension_numbers = #tpu.dot_dimension_numbers<[1], [0], [0], [1], [0, 0, 1, 1], [], []>} : vector<128x256xbf16>, vector<256x128xbf16>, vector<128x128xf32> -> vector<128x128xf32>
    %c0_3 = arith.constant 0 : index
    %c0_4 = arith.constant 0 : index
    %3 = vector.load %arg6[%c0_3, %c0_4] : memref<8x128xf32, #tpu.memory_space<vmem>>, vector<1x128xf32>
    %4 = vector.broadcast %3 : vector<1x128xf32> to vector<128x128xf32>
    %5 = arith.addf %2, %4 : vector<128x128xf32>
    %cst_5 = arith.constant 0.000000e+00 : f32
    %6 = vector.broadcast %cst_5 : f32 to vector<128x128xf32>
    %7 = arith.maximumf %5, %6 : vector<128x128xf32>
    %c0_6 = arith.constant 0 : index
    %c0_7 = arith.constant 0 : index
    %8 = vector.load %arg1[%c0_6, %c0_7] : memref<128x128xbf16, #tpu.memory_space<vmem>>, vector<128x128xbf16>
    %c0_8 = arith.constant 0 : index
    %c0_9 = arith.constant 0 : index
    %9 = vector.load %arg5[%c0_8, %c0_9] : memref<128x128xbf16, #tpu.memory_space<vmem>>, vector<128x128xbf16>
    %cst_10 = arith.constant dense<0.000000e+00> : vector<128x128xf32>
    %10 = tpu.matmul %8, %9, %cst_10 {dimension_numbers = #tpu.dot_dimension_numbers<[1], [0], [0], [1], [0, 0, 1, 1], [], []>} : vector<128x128xbf16>, vector<128x128xbf16>, vector<128x128xf32> -> vector<128x128xf32>
    %c2 = arith.constant 2 : index
    %c0_11 = arith.constant 0 : index
    %11 = vector.load %arg6[%c2, %c0_11] : memref<8x128xf32, #tpu.memory_space<vmem>>, vector<1x128xf32>
    %12 = vector.broadcast %11 : vector<1x128xf32> to vector<128x128xf32>
    %13 = arith.addf %10, %12 : vector<128x128xf32>
    %14 = arith.truncf %7 : vector<128x128xf32> to vector<128x128xbf16>
    %c0_12 = arith.constant 0 : index
    %c0_13 = arith.constant 0 : index
    %15 = vector.load %arg4[%c0_12, %c0_13] : memref<128x128xbf16, #tpu.memory_space<vmem>>, vector<128x128xbf16>
    %cst_14 = arith.constant dense<0.000000e+00> : vector<128x128xf32>
    %16 = tpu.matmul %14, %15, %cst_14 {dimension_numbers = #tpu.dot_dimension_numbers<[1], [0], [0], [1], [0, 0, 1, 1], [], []>} : vector<128x128xbf16>, vector<128x128xbf16>, vector<128x128xf32> -> vector<128x128xf32>
    %c1 = arith.constant 1 : index
    %c0_15 = arith.constant 0 : index
    %17 = vector.load %arg6[%c1, %c0_15] : memref<8x128xf32, #tpu.memory_space<vmem>>, vector<1x128xf32>
    %18 = vector.broadcast %17 : vector<1x128xf32> to vector<128x128xf32>
    %19 = arith.addf %16, %18 : vector<128x128xf32>
    %20 = arith.addf %19, %13 : vector<128x128xf32>
    %cst_16 = arith.constant 0.000000e+00 : f32
    %21 = vector.broadcast %cst_16 : f32 to vector<128x128xf32>
    %22 = arith.maximumf %20, %21 : vector<128x128xf32>
    %23 = tpu.iota {dimensions = array<i32: 1>} : vector<8x128xi32>
    %c128_i32 = arith.constant 128 : i32
    %24 = arith.muli %arg0, %c128_i32 : i32
    %25 = vector.broadcast %24 : i32 to vector<8x128xi32>
    %26 = arith.addi %23, %25 : vector<8x128xi32>
    %27 = tpu.iota {dimensions = array<i32: 0>} : vector<8x128xi32>
    %c64_i32 = arith.constant 64 : i32
    %28 = vector.broadcast %c64_i32 : i32 to vector<8x128xi32>
    %29 = arith.muli %27, %28 : vector<8x128xi32>
    %30 = arith.cmpi sge, %26, %29 : vector<8x128xi32>
    %c1_i32 = arith.constant 1 : i32
    %31 = vector.broadcast %c1_i32 : i32 to vector<8x128xi32>
    %32 = arith.addi %27, %31 : vector<8x128xi32>
    %c64_i32_17 = arith.constant 64 : i32
    %33 = vector.broadcast %c64_i32_17 : i32 to vector<8x128xi32>
    %34 = arith.muli %32, %33 : vector<8x128xi32>
    %35 = arith.cmpi slt, %26, %34 : vector<8x128xi32>
    %36 = arith.andi %30, %35 : vector<8x128xi1>
    %c128_i32_18 = arith.constant 128 : i32
    %37 = vector.broadcast %c128_i32_18 : i32 to vector<8x128xi32>
    %38 = arith.cmpi slt, %26, %37 : vector<8x128xi32>
    %39 = arith.andi %36, %38 : vector<8x128xi1>
    %cst_19 = arith.constant 1.000000e+00 : f32
    %cst_20 = arith.constant 0.000000e+00 : f32
    %40 = vector.broadcast %cst_19 : f32 to vector<8x128xf32>
    %41 = vector.broadcast %cst_20 : f32 to vector<8x128xf32>
    %42 = arith.select %39, %40, %41 : vector<8x128xi1>, vector<8x128xf32>
    %43 = arith.truncf %42 : vector<8x128xf32> to vector<8x128xbf16>
    %44 = arith.truncf %22 : vector<128x128xf32> to vector<128x128xbf16>
    %cst_21 = arith.constant dense<0.000000e+00> : vector<8x128xf32>
    %45 = tpu.matmul %43, %44, %cst_21 {dimension_numbers = #tpu.dot_dimension_numbers<[1], [0], [0], [1], [0, 0, 1, 1], [], []>} : vector<8x128xbf16>, vector<128x128xbf16>, vector<8x128xf32> -> vector<8x128xf32>
    %c0_22 = arith.constant 0 : index
    %c0_23 = arith.constant 0 : index
    %c0_24 = arith.constant 0 : index
    %46 = vector.load %arg7[%c0_22, %c0_23, %c0_24] : memref<1x8x128xf32, #tpu.memory_space<vmem>>, vector<1x8x128xf32>
    %47 = vector.shape_cast %46 : vector<1x8x128xf32> to vector<8x128xf32>
    %48 = vector.shape_cast %45 : vector<8x128xf32> to vector<1x8x128xf32>
    tpu.vector_store %arg7[%c0_22, %c0_23, %c0_24], %48 {strides = array<i32>} : memref<1x8x128xf32, #tpu.memory_space<vmem>>, vector<1x8x128xf32>,
    return
  }
  func.func @transform_0(%arg0: i32) -> (i32, i32) {
    %c0_i32 = arith.constant 0 : i32
    %c0_i32_0 = arith.constant 0 : i32
    return %arg0, %c0_i32 : i32, i32
  }
  func.func @transform_1(%arg0: i32) -> (i32, i32) {
    %c0_i32 = arith.constant 0 : i32
    %c0_i32_0 = arith.constant 0 : i32
    return %arg0, %c0_i32 : i32, i32
  }
  func.func @transform_2(%arg0: i32) -> (i32, i32) {
    %c0_i32 = arith.constant 0 : i32
    %c0_i32_0 = arith.constant 0 : i32
    %c0_i32_1 = arith.constant 0 : i32
    return %c0_i32, %c0_i32_0 : i32, i32
  }
  func.func @transform_3(%arg0: i32) -> (i32, i32) {
    %c0_i32 = arith.constant 0 : i32
    %c0_i32_0 = arith.constant 0 : i32
    %c0_i32_1 = arith.constant 0 : i32
    return %c0_i32, %c0_i32_0 : i32, i32
  }
  func.func @transform_4(%arg0: i32) -> (i32, i32) {
    %c0_i32 = arith.constant 0 : i32
    %c0_i32_0 = arith.constant 0 : i32
    %c0_i32_1 = arith.constant 0 : i32
    return %c0_i32, %c0_i32_0 : i32, i32
  }
  func.func @transform_5(%arg0: i32) -> (i32, i32) {
    %c0_i32 = arith.constant 0 : i32
    %c0_i32_0 = arith.constant 0 : i32
    %c0_i32_1 = arith.constant 0 : i32
    return %c0_i32, %c0_i32_0 : i32, i32
  }
  func.func @transform_6(%arg0: i32) -> (i32, i32, i32) {
    %c0_i32 = arith.constant 0 : i32
    %c0_i32_0 = arith.constant 0 : i32
    %c0_i32_1 = arith.constant 0 : i32
    return %arg0, %c0_i32, %c0_i32_0 : i32, i32, i32
  }
}

module attributes {stable_mosaic.version = 11 : i64} {
  func.func @_finalize_kernel(%arg0: i32, %arg1: memref<1x8x128xf32, #tpu.memory_space<vmem>>, %arg2: memref<128x128xbf16, #tpu.memory_space<vmem>>, %arg3: memref<1x128xf32, #tpu.memory_space<vmem>>, %arg4: memref<8x128xf32, #tpu.memory_space<vmem>>) attributes {dimension_semantics = [#tpu.dimension_semantics<arbitrary>], iteration_bounds = array<i64: 1>, scalar_prefetch = 0 : i64, scratch_operands = 0 : i64, tpu.core_type = #tpu.core_type<tc>, window_params = [{pipeline_mode = #tpu.pipeline_mode<synchronous>, transform_indices = @transform_0, window_bounds = array<i64: 1, 8, 128>}, {pipeline_mode = #tpu.pipeline_mode<synchronous>, transform_indices = @transform_1, window_bounds = array<i64: 128, 128>}, {pipeline_mode = #tpu.pipeline_mode<synchronous>, transform_indices = @transform_2, window_bounds = array<i64: 1, 128>}, {pipeline_mode = #tpu.pipeline_mode<synchronous>, transform_indices = @transform_3, window_bounds = array<i64: 8, 128>}]} {
    %c0 = arith.constant 0 : index
    %c0_0 = arith.constant 0 : index
    %c0_1 = arith.constant 0 : index
    %0 = vector.load %arg1[%c0, %c0_0, %c0_1] : memref<1x8x128xf32, #tpu.memory_space<vmem>>, vector<1x8x128xf32>
    %cst = arith.constant dense<0.000000e+00> : vector<8x128xf32>
    %1 = vector.multi_reduction <add>, %0, %cst [0] : vector<1x8x128xf32> to vector<8x128xf32>
    %cst_2 = arith.constant 1.562500e-02 : f32
    %2 = vector.broadcast %cst_2 : f32 to vector<8x128xf32>
    %3 = arith.mulf %1, %2 : vector<8x128xf32>
    %4 = arith.truncf %3 : vector<8x128xf32> to vector<8x128xbf16>
    %c0_3 = arith.constant 0 : index
    %c0_4 = arith.constant 0 : index
    %5 = vector.load %arg2[%c0_3, %c0_4] : memref<128x128xbf16, #tpu.memory_space<vmem>>, vector<128x128xbf16>
    %cst_5 = arith.constant dense<0.000000e+00> : vector<8x128xf32>
    %6 = tpu.matmul %4, %5, %cst_5 {dimension_numbers = #tpu.dot_dimension_numbers<[1], [0], [0], [1], [0, 0, 1, 1], [], []>} : vector<8x128xbf16>, vector<128x128xbf16>, vector<8x128xf32> -> vector<8x128xf32>
    %c0_6 = arith.constant 0 : index
    %c0_7 = arith.constant 0 : index
    %7 = vector.load %arg3[%c0_6, %c0_7] : memref<1x128xf32, #tpu.memory_space<vmem>>, vector<1x128xf32>
    %8 = vector.broadcast %7 : vector<1x128xf32> to vector<8x128xf32>
    %9 = arith.addf %6, %8 : vector<8x128xf32>
    %c0_8 = arith.constant 0 : index
    %c0_9 = arith.constant 0 : index
    %10 = vector.load %arg4[%c0_8, %c0_9] : memref<8x128xf32, #tpu.memory_space<vmem>>, vector<8x128xf32>
    tpu.vector_store %arg4[%c0_8, %c0_9], %9 {strides = array<i32>} : memref<8x128xf32, #tpu.memory_space<vmem>>, vector<8x128xf32>,
    return
  }
  func.func @transform_0(%arg0: i32) -> (i32, i32, i32) {
    %c0_i32 = arith.constant 0 : i32
    %c0_i32_0 = arith.constant 0 : i32
    %c0_i32_1 = arith.constant 0 : i32
    %c0_i32_2 = arith.constant 0 : i32
    return %c0_i32, %c0_i32_0, %c0_i32_1 : i32, i32, i32
  }
  func.func @transform_1(%arg0: i32) -> (i32, i32) {
    %c0_i32 = arith.constant 0 : i32
    %c0_i32_0 = arith.constant 0 : i32
    %c0_i32_1 = arith.constant 0 : i32
    return %c0_i32, %c0_i32_0 : i32, i32
  }
  func.func @transform_2(%arg0: i32) -> (i32, i32) {
    %c0_i32 = arith.constant 0 : i32
    %c0_i32_0 = arith.constant 0 : i32
    %c0_i32_1 = arith.constant 0 : i32
    return %c0_i32, %c0_i32_0 : i32, i32
  }
  func.func @transform_3(%arg0: i32) -> (i32, i32) {
    %c0_i32 = arith.constant 0 : i32
    %c0_i32_0 = arith.constant 0 : i32
    %c0_i32_1 = arith.constant 0 : i32
    return %c0_i32, %c0_i32_0 : i32, i32
  }
}

</mosaic_0001>

<bundles_post_ra>
// kernel: encoder_cnn_forward.3
= control target key start
LH: loop header
LB: loop body
LE: loop exit
PB: predicated region body
PF: predicated region fallthrough
CT: control target
= control target key end

     0   :  { %vm97_vm0 = vcmask 261120   ;;  %s1047_s1 = inlined_call_operand.vmem [shape: bf16[32,128], index: 1, kind: input, shape index: {}]   ;;  %s1048_s0 = inlined_call_operand.vmem [shape: bf16[128,32], index: 0, kind: input, shape index: {}]   ;;  %s1049_s2 = inlined_call_operand.vmem [shape: bf16[128,128], index: 2, kind: input, shape index: {}]   ;;  %s1050_s3 = inlined_call_operand.vmem [shape: f32[8,128], index: 3, kind: input, shape index: {}]   ;;  %s1051_s4 = inlined_call_operand.vmem [shape: bf16[128,128], index: 4, kind: output, shape index: {0}]   ;;  %s1052_s5 = inlined_call_operand.vmem [shape: bf16[128,128], index: 5, kind: output, shape index: {1}]  }
   0x1   :  { %v865_v0 = vld [vmem:[%s1047_s1] sm:$0xff]   ;;  %v866_v1 = vld [vmem:[%s1047_s1 + $0x8] sm:$0xff]   ;;  %v869_v4 = vld [vmem:[%s1048_s0 + $0x10] sm:$0xff]  }
   0x2   :  { %797 = vmatprep.subr.bf16.mxu0 %v865_v0  ;;  %v867_v2 = vld [vmem:[%s1048_s0] sm:$0xff]   ;;  %v868_v3 = vld [vmem:[%s1048_s0 + $0x8] sm:$0xff]   ;;  %v870_v7 = vld [vmem:[%s1048_s0 + $0x18] sm:$0xff]  }
   0x3   :  { %798 = vmatpush3.bf16.msra.mxu0 %v865_v0  ;;  %801 = vmatprep.mubr.msk.bf16.mxu0 %vm97_vm0, %v867_v2  ;;  %v875_v5 = vld [vmem:[%s1049_s2] sm:$0xff]   ;;  %v876_v6 = vld [vmem:[%s1049_s2 + $0x8] sm:$0xff]   ;;  %v877_v8 = vld [vmem:[%s1049_s2 + $0x10] sm:$0xff]  }
   0x4   :  { %799 = vmatprep.subr.bf16.mxu0 %v866_v1  ;;  %849 = vmatprep.subr.bf16.mxu1 %v875_v5  ;;  %v871_v9 = vld [vmem:[%s1048_s0 + $0x20] sm:$0xff]   ;;  %v878_v10 = vld [vmem:[%s1049_s2 + $0x18] sm:$0xff]   ;;  %v872_v11 = vld [vmem:[%s1048_s0 + $0x28] sm:$0xff]  }
   0x5   :  { %857 = vmatpush3.bf16.msra.mxu1 %v875_v5  ;;  %v879_v12 = vld [vmem:[%s1049_s2 + $0x20] sm:$0xff]   ;;  %v873_v13 = vld [vmem:[%s1048_s0 + $0x30] sm:$0xff]   ;;  %v880_v14 = vld [vmem:[%s1049_s2 + $0x28] sm:$0xff]  }
   0x6   :  { %850 = vmatprep.subr.bf16.mxu1 %v876_v6  ;;  %v874_v15 = vld [vmem:[%s1048_s0 + $0x38] sm:$0xff]   ;;  %v881_v16 = vld [vmem:[%s1049_s2 + $0x30] sm:$0xff]   ;;  %v978_v18 = vld [vmem:[%s1050_s3] ss:$0 sm:$0xff] }
   0x7   :  { %800 = vmatpush3.bf16.msra.mxu0 %v866_v1  ;;  %v882_v17 = vld [vmem:[%s1049_s2 + $0x38] sm:$0xff]  }
   0x8   :  { %817 = vmatprep.subr.bf16.mxu0 %v875_v5 }
   0x9   :  { %858 = vmatpush3.bf16.msra.mxu1 %v876_v6 }
   0xa   :  { %802 = vmatmul.mubr.msk.bf16.vlgmr.msra.gmra.mrb[0].mxu0 %vm97_vm0, %v868_v3  ;;  %851 = vmatprep.subr.bf16.mxu1 %v877_v8 }
   0xb   :  { %805 = vmatprep.mubr.msk.bf16.mxu0 %vm97_vm0, %v869_v4  ;;  %818 = vmatpush3.bf16.msra.mxu0 %v875_v5 }
   0xc   :  { %819 = vmatprep.subr.bf16.mxu0 %v876_v6 }
   0xd   :  { %859 = vmatpush3.bf16.msra.mxu1 %v877_v8 }
   0xe   :  { %852 = vmatprep.subr.bf16.mxu1 %v878_v10 }
   0xf   :  { %820 = vmatpush3.bf16.msra.mxu0 %v876_v6 }
  0x10   :  { %821 = vmatprep.subr.bf16.mxu0 %v877_v8 }
  0x11   :  { %860 = vmatpush3.bf16.msra.mxu1 %v878_v10 }
  0x12   :  { %806 = vmatmul.mubr.msk.bf16.gmra.mrb[4].mxu0 %vm97_vm0, %v870_v7  ;;  %853 = vmatprep.subr.bf16.mxu1 %v879_v12 }
  0x13   :  { %809 = vmatprep.mubr.msk.bf16.mxu0 %vm97_vm0, %v871_v9  ;;  %822 = vmatpush3.bf16.msra.mxu0 %v877_v8 }
  0x14   :  { %823 = vmatprep.subr.bf16.mxu0 %v878_v10 }
  0x15   :  { %861 = vmatpush3.bf16.msra.mxu1 %v879_v12 }
  0x16   :  { %854 = vmatprep.subr.bf16.mxu1 %v880_v14 }
  0x17   :  { %824 = vmatpush3.bf16.msra.mxu0 %v878_v10 }
  0x18   :  { %825 = vmatprep.subr.bf16.mxu0 %v879_v12 }
  0x19   :  { %862 = vmatpush3.bf16.msra.mxu1 %v880_v14 }
  0x1a   :  { %810 = vmatmul.mubr.msk.bf16.gmra.mrb[8].mxu0 %vm97_vm0, %v872_v11  ;;  %855 = vmatprep.subr.bf16.mxu1 %v881_v16  ;;  %v604_v11 = vld [vmem:[%s1050_s3 + $0x1] ss:$0 sm:$0xff] }
  0x1b   :  { %813 = vmatprep.mubr.msk.bf16.mxu0 %vm97_vm0, %v873_v13  ;;  %826 = vmatpush3.bf16.msra.mxu0 %v879_v12 }
  0x1c   :  { %827 = vmatprep.subr.bf16.mxu0 %v880_v14 }
  0x1d   :  { %863 = vmatpush3.bf16.msra.mxu1 %v881_v16 }
  0x1e   :  { %856 = vmatprep.subr.bf16.mxu1 %v882_v17 }
  0x1f   :  { %828 = vmatpush3.bf16.msra.mxu0 %v880_v14 }
  0x20   :  { %829 = vmatprep.subr.bf16.mxu0 %v881_v16 }
  0x21   :  { %864 = vmatpush3.bf16.msra.mxu1 %v882_v17 }
  0x22   :  { %814 = vmatmul.mubr.msk.bf16.gmra.mrb[12].mxu0 %vm97_vm0, %v874_v15 }
  0x23   :  { %830 = vmatpush3.bf16.msra.mxu0 %v881_v16 }
  0x24   :  { %831 = vmatprep.subr.bf16.mxu0 %v882_v17 }
  0x27   :  { %832 = vmatpush3.bf16.msra.mxu0 %v882_v17 }
  0xdd   :  { %v803_v19 = vpop.f32.mrb[0].mxu0 }
  0xde   :  { %v165_v20 = vadd.f32 %v803_v19, %v978_v18  ;;  %v156_v21 = vpop.f32.mrb[1].mxu0 }
  0xdf   :  { %v157_v22 = vadd.f32 %v978_v18, %v156_v21  ;;  %v804_v23 = vpop.f32.mrb[2].mxu0 }
  0xe0   :  { %v168_v24 = vadd.f32 %v804_v23, %v978_v18  ;;  %v159_v25 = vpop.f32.mrb[3].mxu0  ;;  %v221_v27 = vmax.f32 %v165_v20, 0.0 }
  0xe1   :  { %v160_v26 = vadd.f32 %v978_v18, %v159_v25  ;;  %v219_v29 = vmax.f32 %v157_v22, 0.0 }
  0xe2   :  { %v222_v28 = vmax.f32 %v168_v24, 0.0 }
  0xe3   :  { %v220_v30 = vmax.f32 %v160_v26, 0.0 }
  0xe4   :  { %v236_v31 = vpack.c.bf16 %v222_v28, %v221_v27 }
  0xe5   :  { %v235_v32 = vpack.c.bf16 %v220_v30, %v219_v29  ;;  %v807_v33 = vpop.f32.mrb[4].mxu0 }
  0xe6   :  { %757 = vst [vmem:[%s1051_s4 + $0x8] sm:$0xff] %v236_v31   ;;  %v181_v34 = vadd.f32 %v807_v33, %v978_v18  ;;  %v172_v35 = vpop.f32.mrb[5].mxu0 }
  0xe7   :  { %681 = vst [vmem:[%s1051_s4] sm:$0xff] %v235_v32   ;;  %v173_v36 = vadd.f32 %v978_v18, %v172_v35  ;;  %v808_v37 = vpop.f32.mrb[6].mxu0  ;;  %833 = vmatprep.mubr.bf16.mxu0 %v235_v32 }
  0xe8   :  { %v184_v38 = vadd.f32 %v808_v37, %v978_v18  ;;  %v175_v39 = vpop.f32.mrb[7].mxu0  ;;  %834 = vmatmul.mubr.bf16.vlgmr.msra.gmra.mrb[16].mxu0 %v236_v31  ;;  %v225_v41 = vmax.f32 %v181_v34, 0.0 }
  0xe9   :  { %v176_v40 = vadd.f32 %v978_v18, %v175_v39  ;;  %v223_v43 = vmax.f32 %v173_v36, 0.0 }
  0xea   :  { %v226_v42 = vmax.f32 %v184_v38, 0.0 }
  0xeb   :  { %v224_v44 = vmax.f32 %v176_v40, 0.0 }
  0xec   :  { %v238_v45 = vpack.c.bf16 %v226_v42, %v225_v41 }
  0xed   :  { %v811_v46 = vpop.f32.mrb[8].mxu0  ;;  %v237_v47 = vpack.c.bf16 %v224_v44, %v223_v43 }
  0xee   :  { %759 = vst [vmem:[%s1051_s4 + $0x18] sm:$0xff] %v238_v45   ;;  %v197_v48 = vadd.f32 %v811_v46, %v978_v18  ;;  %v188_v49 = vpop.f32.mrb[9].mxu0 }
  0xef   :  { %v189_v50 = vadd.f32 %v978_v18, %v188_v49  ;;  %v812_v51 = vpop.f32.mrb[10].mxu0  ;;  %837 = vmatprep.mubr.bf16.mxu1 %v237_v47  ;;  %758 = vst [vmem:[%s1051_s4 + $0x10] sm:$0xff] %v237_v47  }
  0xf0   :  { %v200_v52 = vadd.f32 %v812_v51, %v978_v18  ;;  %v191_v53 = vpop.f32.mrb[11].mxu0  ;;  %838 = vmatmul.mubr.bf16.vlgmr.msra.gmra.mrb[0].mxu1 %v238_v45  ;;  %v229_v55 = vmax.f32 %v197_v48, 0.0 }
  0xf1   :  { %v192_v54 = vadd.f32 %v978_v18, %v191_v53  ;;  %v227_v57 = vmax.f32 %v189_v50, 0.0 }
  0xf2   :  { %v230_v56 = vmax.f32 %v200_v52, 0.0 }
  0xf3   :  { %v228_v58 = vmax.f32 %v192_v54, 0.0 }
  0xf4   :  { %v240_v59 = vpack.c.bf16 %v230_v56, %v229_v55 }
  0xf5   :  { %v239_v60 = vpack.c.bf16 %v228_v58, %v227_v57  ;;  %v815_v61 = vpop.f32.mrb[12].mxu0 }
  0xf6   :  { %761 = vst [vmem:[%s1051_s4 + $0x28] sm:$0xff] %v240_v59   ;;  %v213_v62 = vadd.f32 %v815_v61, %v978_v18  ;;  %v204_v63 = vpop.f32.mrb[13].mxu0 }
  0xf7   :  { %760 = vst [vmem:[%s1051_s4 + $0x20] sm:$0xff] %v239_v60   ;;  %v205_v0 = vadd.f32 %v978_v18, %v204_v63  ;;  %v816_v1 = vpop.f32.mrb[14].mxu0  ;;  %841 = vmatprep.mubr.bf16.mxu1 %v239_v60 }
  0xf8   :  { %v216_v2 = vadd.f32 %v816_v1, %v978_v18  ;;  %v207_v3 = vpop.f32.mrb[15].mxu0  ;;  %842 = vmatmul.mubr.bf16.gmra.mrb[4].mxu1 %v240_v59  ;;  %v233_v5 = vmax.f32 %v213_v62, 0.0 }
  0xf9   :  { %v208_v4 = vadd.f32 %v978_v18, %v207_v3  ;;  %v231_v7 = vmax.f32 %v205_v0, 0.0 }
  0xfa   :  { %v234_v6 = vmax.f32 %v216_v2, 0.0 }
  0xfb   :  { %v232_v8 = vmax.f32 %v208_v4, 0.0 }
  0xfc   :  { %v242_v9 = vpack.c.bf16 %v234_v6, %v233_v5 }
  0xfd   :  { %v241_v10 = vpack.c.bf16 %v232_v8, %v231_v7 }
  0xfe   :  { %763 = vst [vmem:[%s1051_s4 + $0x38] sm:$0xff] %v242_v9  }
  0xff   :  { %762 = vst [vmem:[%s1051_s4 + $0x30] sm:$0xff] %v241_v10   ;;  %845 = vmatprep.mubr.bf16.mxu1 %v241_v10 }
 0x100   :  { %846 = vmatmul.mubr.bf16.gmra.mrb[8].mxu1 %v242_v9 }
 0x1bb   :  { %v835_v12 = vpop.f32.mrb[16].mxu0 }
 0x1bc   :  { %v355_v13 = vadd.f32 %v835_v12, %v604_v11  ;;  %v346_v14 = vpop.f32.mrb[17].mxu0 }
 0x1bd   :  { %v347_v15 = vadd.f32 %v604_v11, %v346_v14  ;;  %v836_v16 = vpop.f32.mrb[18].mxu0 }
 0x1be   :  { %v358_v17 = vadd.f32 %v836_v16, %v604_v11  ;;  %v349_v18 = vpop.f32.mrb[19].mxu0  ;;  %v411_v20 = vmax.f32 %v355_v13, 0.0 }
 0x1bf   :  { %v350_v19 = vadd.f32 %v604_v11, %v349_v18  ;;  %v409_v22 = vmax.f32 %v347_v15, 0.0 }
 0x1c0   :  { %v412_v21 = vmax.f32 %v358_v17, 0.0 }
 0x1c1   :  { %v410_v23 = vmax.f32 %v350_v19, 0.0 }
 0x1c2   :  { %v725_v24 = vpack.c.bf16 %v412_v21, %v411_v20 }
 0x1c3   :  { %v720_v25 = vpack.c.bf16 %v410_v23, %v409_v22  ;;  %v839_v26 = vpop.f32.mrb[0].mxu1 }
 0x1c4   :  { %764 = vst [vmem:[%s1052_s5 + $0x8] sm:$0xff] %v725_v24   ;;  %v371_v27 = vadd.f32 %v839_v26, %v604_v11  ;;  %v362_v28 = vpop.f32.mrb[1].mxu1 }
 0x1c5   :  { %721 = vst [vmem:[%s1052_s5] sm:$0xff] %v720_v25   ;;  %v363_v29 = vadd.f32 %v604_v11, %v362_v28  ;;  %v840_v30 = vpop.f32.mrb[2].mxu1 }
 0x1c6   :  { %v374_v31 = vadd.f32 %v840_v30, %v604_v11  ;;  %v365_v32 = vpop.f32.mrb[3].mxu1  ;;  %v415_v34 = vmax.f32 %v371_v27, 0.0 }
 0x1c7   :  { %v366_v33 = vadd.f32 %v604_v11, %v365_v32  ;;  %v413_v36 = vmax.f32 %v363_v29, 0.0 }
 0x1c8   :  { %v416_v35 = vmax.f32 %v374_v31, 0.0 }
 0x1c9   :  { %v414_v37 = vmax.f32 %v366_v33, 0.0 }
 0x1ca   :  { %v735_v38 = vpack.c.bf16 %v416_v35, %v415_v34 }
 0x1cb   :  { %v730_v39 = vpack.c.bf16 %v414_v37, %v413_v36  ;;  %v843_v40 = vpop.f32.mrb[4].mxu1 }
 0x1cc   :  { %766 = vst [vmem:[%s1052_s5 + $0x18] sm:$0xff] %v735_v38   ;;  %v387_v41 = vadd.f32 %v843_v40, %v604_v11  ;;  %v378_v42 = vpop.f32.mrb[5].mxu1 }
 0x1cd   :  { %765 = vst [vmem:[%s1052_s5 + $0x10] sm:$0xff] %v730_v39   ;;  %v379_v43 = vadd.f32 %v604_v11, %v378_v42  ;;  %v844_v44 = vpop.f32.mrb[6].mxu1 }
 0x1ce   :  { %v390_v45 = vadd.f32 %v844_v44, %v604_v11  ;;  %v381_v46 = vpop.f32.mrb[7].mxu1  ;;  %v419_v48 = vmax.f32 %v387_v41, 0.0 }
 0x1cf   :  { %v382_v47 = vadd.f32 %v604_v11, %v381_v46  ;;  %v417_v50 = vmax.f32 %v379_v43, 0.0 }
 0x1d0   :  { %v420_v49 = vmax.f32 %v390_v45, 0.0 }
 0x1d1   :  { %v418_v51 = vmax.f32 %v382_v47, 0.0 }
 0x1d2   :  { %v745_v52 = vpack.c.bf16 %v420_v49, %v419_v48 }
 0x1d3   :  { %v740_v53 = vpack.c.bf16 %v418_v51, %v417_v50  ;;  %v847_v54 = vpop.f32.mrb[8].mxu1 }
 0x1d4   :  { %768 = vst [vmem:[%s1052_s5 + $0x28] sm:$0xff] %v745_v52   ;;  %v403_v55 = vadd.f32 %v847_v54, %v604_v11  ;;  %v394_v56 = vpop.f32.mrb[9].mxu1 }
 0x1d5   :  { %767 = vst [vmem:[%s1052_s5 + $0x20] sm:$0xff] %v740_v53   ;;  %v395_v57 = vadd.f32 %v604_v11, %v394_v56  ;;  %v848_v58 = vpop.f32.mrb[10].mxu1 }
 0x1d6   :  { %v406_v59 = vadd.f32 %v848_v58, %v604_v11  ;;  %v397_v60 = vpop.f32.mrb[11].mxu1  ;;  %v423_v62 = vmax.f32 %v403_v55, 0.0 }
 0x1d7   :  { %v398_v61 = vadd.f32 %v604_v11, %v397_v60  ;;  %v421_v0 = vmax.f32 %v395_v57, 0.0 }
 0x1d8   :  { %v424_v63 = vmax.f32 %v406_v59, 0.0 }
 0x1d9   :  { %v422_v1 = vmax.f32 %v398_v61, 0.0 }
 0x1da   :  { %v755_v2 = vpack.c.bf16 %v424_v63, %v423_v62 }
 0x1db   :  { %v750_v3 = vpack.c.bf16 %v422_v1, %v421_v0 }
 0x1dc   :  { %770 = vst [vmem:[%s1052_s5 + $0x38] sm:$0xff] %v755_v2  }
 0x1dd   :  { %769 = vst [vmem:[%s1052_s5 + $0x30] sm:$0xff] %v750_v3  }

// kernel: encoder_cnn_forward.5
= control target key start
LH: loop header
LB: loop body
LE: loop exit
PB: predicated region body
PF: predicated region fallthrough
CT: control target
= control target key end

     0   :  { %v183_v0 = vmov 0.0   ;;  %vm184_vm0 = vmmov 0   ;;  %s238_s1 = inlined_call_operand.vmem [shape: bf16[128,128], index: 1, kind: input, shape index: {}]   ;;  %s239_s0 = inlined_call_operand.vmem [shape: f32[1,8,128], index: 0, kind: input, shape index: {}]   ;;  %s240_s2 = inlined_call_operand.vmem [shape: f32[1,128], index: 2, kind: input, shape index: {}]   ;;  %s241_s3 = inlined_call_operand.vmem [shape: f32[8,128], index: 3, kind: output, shape index: {}]  }
   0x1   :  { %153 = vmatprep.subr.bf16.mxu0 %v183_v0  ;;  %v175_v1 = vld [vmem:[%s238_s1] sm:$0xff]   ;;  %169 = vmatprep.mubr.msk.bf16.mxu0 %vm184_vm0, %v183_v0  ;;  %v176_v2 = vld [vmem:[%s238_s1 + $0x8] sm:$0xff]   ;;  %v177_v3 = vld [vmem:[%s238_s1 + $0x10] sm:$0xff]  }
   0x2   :  { %154 = vmatpush3.bf16.msra.mxu0 %v175_v1  ;;  %v178_v4 = vld [vmem:[%s238_s1 + $0x18] sm:$0xff]   ;;  %v179_v5 = vld [vmem:[%s238_s1 + $0x20] sm:$0xff]   ;;  %v180_v6 = vld [vmem:[%s238_s1 + $0x28] sm:$0xff]  }
   0x3   :  { %155 = vmatprep.subr.bf16.mxu0 %v183_v0  ;;  %v181_v7 = vld [vmem:[%s238_s1 + $0x30] sm:$0xff]   ;;  %v15_v8 = vld [vmem:[%s239_s0] sm:$0xff]  ;;  %v182_v10 = vld [vmem:[%s238_s1 + $0x38] sm:$0xff]  }
   0x4   :  { %v17_v9 = vmul.f32 0.015625, %v15_v8  ;;  %v135_v12 = vld [vmem:[%s240_s2] ss:$0 sm:$0xff] }
   0x6   :  { %156 = vmatpush3.bf16.msra.mxu0 %v176_v2  ;;  %v18_v11 = vpack.c.bf16 %v17_v9, %v17_v9 }
   0x7   :  { %157 = vmatprep.subr.bf16.mxu0 %v183_v0 }
   0xa   :  { %158 = vmatpush3.bf16.msra.mxu0 %v177_v3 }
   0xb   :  { %159 = vmatprep.subr.bf16.mxu0 %v183_v0 }
   0xe   :  { %160 = vmatpush3.bf16.msra.mxu0 %v178_v4 }
   0xf   :  { %161 = vmatprep.subr.bf16.mxu0 %v183_v0 }
  0x12   :  { %162 = vmatpush3.bf16.msra.mxu0 %v179_v5 }
  0x13   :  { %163 = vmatprep.subr.bf16.mxu0 %v183_v0 }
  0x16   :  { %164 = vmatpush3.bf16.msra.mxu0 %v180_v6 }
  0x17   :  { %165 = vmatprep.subr.bf16.mxu0 %v183_v0 }
  0x1a   :  { %166 = vmatpush3.bf16.msra.mxu0 %v181_v7 }
  0x1b   :  { %167 = vmatprep.subr.bf16.mxu0 %v183_v0 }
  0x1e   :  { %168 = vmatpush3.bf16.msra.mxu0 %v182_v10 }
  0x21   :  { %170 = vmatmul.mubr.bf16.vlgmr.msra.gmra.mrb[0].mxu0 %v18_v11 }
  0xf4   :  { %v124_v13 = vpop.f32.mrb[0].mxu0 }
  0xf5   :  { %v125_v14 = vadd.f32 %v135_v12, %v124_v13  ;;  %v171_v15 = vpop.f32.mrb[1].mxu0 }
  0xf6   :  { %v127_v16 = vpop.f32.mrb[2].mxu0 }
  0xf7   :  { %130 = vst [vmem:[%s241_s3] sm:$0xff] %v125_v14  ;;  %v172_v17 = vpop.f32.mrb[3].mxu0 }

// kernel: encoder_cnn_forward.4
= control target key start
LH: loop header
LB: loop body
LE: loop exit
PB: predicated region body
PF: predicated region fallthrough
CT: control target
= control target key end

     0   :  { %vm1238_vm0 = vmmov 0   ;;  %s1498_s2 = inlined_call_operand.vmem [shape: bf16[256,128], index: 2, kind: input, shape index: {}]   ;;  %s1499_s1 = inlined_call_operand.vmem [shape: bf16[128,256], index: 1, kind: input, shape index: {}]   ;;  %s1500_s4 = inlined_call_operand.vmem [shape: bf16[128,128], index: 4, kind: input, shape index: {}]   ;;  %s1501_s0 = inlined_call_operand.vmem [shape: bf16[128,128], index: 0, kind: input, shape index: {}]   ;;  %s1502_s3 = inlined_call_operand.vmem [shape: bf16[128,128], index: 3, kind: input, shape index: {}]   ;;  %s1503_s5 = inlined_call_operand.vmem [shape: f32[8,128], index: 5, kind: input, shape index: {}]   ;;  %s1504_s6 = inlined_call_operand.vmem [shape: f32[1,8,128], index: 6, kind: output, shape index: {}]  }
   0x1   :  { %v1173_v0 = vld [vmem:[%s1498_s2 + $0x40] sm:$0xff]   ;;  %v1175_v2 = vld [vmem:[%s1498_s2 + $0x48] sm:$0xff]   ;;  %v1177_v4 = vld [vmem:[%s1498_s2 + $0x50] sm:$0xff]  }
   0x2   :  { %v1174_v1 = vld [vmem:[%s1498_s2] sm:$0xff]   ;;  %933 = vmatprep.subr.bf16.mxu0 %v1173_v0  ;;  %v1176_v3 = vld [vmem:[%s1498_s2 + $0x8] sm:$0xff]   ;;  %v1178_v5 = vld [vmem:[%s1498_s2 + $0x10] sm:$0xff]  }
   0x3   :  { %934 = vmatpush3.bf16.msra.mxu0 %v1174_v1  ;;  %v1179_v6 = vld [vmem:[%s1498_s2 + $0x58] sm:$0xff]   ;;  %v1181_v8 = vld [vmem:[%s1498_s2 + $0x60] sm:$0xff]   ;;  %v1183_v10 = vld [vmem:[%s1498_s2 + $0x68] sm:$0xff]  }
   0x4   :  { %935 = vmatprep.subr.bf16.mxu0 %v1175_v2  ;;  %v1180_v7 = vld [vmem:[%s1498_s2 + $0x18] sm:$0xff]   ;;  %v1182_v9 = vld [vmem:[%s1498_s2 + $0x20] sm:$0xff]   ;;  %v1184_v12 = vld [vmem:[%s1498_s2 + $0x28] sm:$0xff]  }
   0x5   :  { %v1191_v11 = vld [vmem:[%s1499_s1 + $0x4] ss:$8 sps:$4 sm:$0xff]   ;;  %v1185_v13 = vld [vmem:[%s1498_s2 + $0x70] sm:$0xff]   ;;  %v1187_v15 = vld [vmem:[%s1498_s2 + $0x78] sm:$0xff]  }
   0x6   :  { %285 = vmatprep.mubr.bf16.mxu0 %v1191_v11  ;;  %v1186_v14 = vld [vmem:[%s1498_s2 + $0x30] sm:$0xff]   ;;  %v1188_v16 = vld [vmem:[%s1498_s2 + $0x38] sm:$0xff]   ;;  %v1213_v17 = vld [vmem:[%s1500_s4] sm:$0xff]  }
   0x7   :  { %936 = vmatpush3.bf16.msra.mxu0 %v1176_v3  ;;  %v1214_v18 = vld [vmem:[%s1500_s4 + $0x8] sm:$0xff]   ;;  %1038 = vmatprep.subr.bf16.mxu1 %v1213_v17  ;;  %v1192_v20 = vld [vmem:[%s1499_s1 + $0x14] ss:$8 sps:$4 sm:$0xff]   ;;  %v1221_v23 = vld [vmem:[%s1501_s0] sm:$0xff]  }
   0x8   :  { %937 = vmatprep.subr.bf16.mxu0 %v1177_v4  ;;  %v1189_v19 = vld [vmem:[%s1499_s1] ss:$8 sps:$4 sm:$0xff]   ;;  %1039 = vmatpush3.bf16.msra.mxu1 %v1213_v17  ;;  %v1215_v21 = vld [vmem:[%s1500_s4 + $0x10] sm:$0xff]   ;;  %v1216_v22 = vld [vmem:[%s1500_s4 + $0x18] sm:$0xff]  }
   0x9   :  { %1040 = vmatprep.subr.bf16.mxu1 %v1214_v18  ;;  %v1194_v24 = vld [vmem:[%s1499_s1 + $0x10] ss:$8 sps:$4 sm:$0xff]   ;;  %1054 = vmatprep.mubr.bf16.mxu1 %v1221_v23  ;;  %v1195_v25 = vld [vmem:[%s1499_s1 + $0x24] ss:$8 sps:$4 sm:$0xff]   ;;  %v1197_v28 = vld [vmem:[%s1499_s1 + $0x20] ss:$8 sps:$4 sm:$0xff]  }
   0xa   :  { %v1217_v26 = vld [vmem:[%s1500_s4 + $0x20] sm:$0xff]   ;;  %v1218_v27 = vld [vmem:[%s1500_s4 + $0x28] sm:$0xff]   ;;  %v1198_v29 = vld [vmem:[%s1499_s1 + $0x34] ss:$8 sps:$4 sm:$0xff]  }
   0xb   :  { %938 = vmatpush3.bf16.msra.mxu0 %v1178_v5  ;;  %v1219_v30 = vld [vmem:[%s1500_s4 + $0x30] sm:$0xff]   ;;  %v1220_v31 = vld [vmem:[%s1500_s4 + $0x38] sm:$0xff]   ;;  %v1201_v33 = vld [vmem:[%s1499_s1 + $0x44] ss:$8 sps:$4 sm:$0xff]  }
   0xc   :  { %939 = vmatprep.subr.bf16.mxu0 %v1179_v6  ;;  %1041 = vmatpush3.bf16.msra.mxu1 %v1214_v18  ;;  %v1200_v32 = vld [vmem:[%s1499_s1 + $0x30] ss:$8 sps:$4 sm:$0xff]   ;;  %v1223_v34 = vld [vmem:[%s1502_s3] sm:$0xff]   ;;  %v1222_v35 = vld [vmem:[%s1501_s0 + $0x8] sm:$0xff]  }
   0xd   :  { %1042 = vmatprep.subr.bf16.mxu1 %v1215_v21  ;;  %v1225_v36 = vld [vmem:[%s1501_s0 + $0x10] sm:$0xff]   ;;  %v1224_v37 = vld [vmem:[%s1502_s3 + $0x8] sm:$0xff]   ;;  %v1226_v41 = vld [vmem:[%s1501_s0 + $0x18] sm:$0xff]  }
   0xe   :  { %v1203_v38 = vld [vmem:[%s1499_s1 + $0x40] ss:$8 sps:$4 sm:$0xff]   ;;  %v1204_v39 = vld [vmem:[%s1499_s1 + $0x54] ss:$8 sps:$4 sm:$0xff]   ;;  %v1206_v42 = vld [vmem:[%s1499_s1 + $0x50] ss:$8 sps:$4 sm:$0xff]  }
   0xf   :  { %940 = vmatpush3.bf16.msra.mxu0 %v1180_v7  ;;  %v1227_v40 = vld [vmem:[%s1502_s3 + $0x10] sm:$0xff]   ;;  %v1207_v43 = vld [vmem:[%s1499_s1 + $0x64] ss:$8 sps:$4 sm:$0xff]   ;;  %v1209_v44 = vld [vmem:[%s1499_s1 + $0x60] ss:$8 sps:$4 sm:$0xff]  }
  0x10   :  { %941 = vmatprep.subr.bf16.mxu0 %v1181_v8  ;;  %1043 = vmatpush3.bf16.msra.mxu1 %v1215_v21  ;;  %v1210_v45 = vld [vmem:[%s1499_s1 + $0x74] ss:$8 sps:$4 sm:$0xff]   ;;  %v1212_v46 = vld [vmem:[%s1499_s1 + $0x70] ss:$8 sps:$4 sm:$0xff]   ;;  %v1229_v48 = vld [vmem:[%s1501_s0 + $0x20] sm:$0xff]  }
  0x11   :  { %1044 = vmatprep.subr.bf16.mxu1 %v1216_v22  ;;  %v1228_v47 = vld [vmem:[%s1502_s3 + $0x18] sm:$0xff]   ;;  %v1230_v49 = vld [vmem:[%s1501_s0 + $0x28] sm:$0xff]   ;;  %v1231_v50 = vld [vmem:[%s1502_s3 + $0x20] sm:$0xff]  }
  0x12   :  { %v1232_v51 = vld [vmem:[%s1502_s3 + $0x28] sm:$0xff]   ;;  %v1233_v52 = vld [vmem:[%s1501_s0 + $0x30] sm:$0xff]   ;;  %v1234_v53 = vld [vmem:[%s1501_s0 + $0x38] sm:$0xff]  }
  0x13   :  { %942 = vmatpush3.bf16.msra.mxu0 %v1182_v9  ;;  %v1235_v54 = vld [vmem:[%s1502_s3 + $0x30] sm:$0xff]   ;;  %v1236_v55 = vld [vmem:[%s1502_s3 + $0x38] sm:$0xff]   ;;  %v1446_v57 = vld [vmem:[%s1503_s5] ss:$0 sm:$0xff] }
  0x14   :  { %943 = vmatprep.subr.bf16.mxu0 %v1183_v10  ;;  %1045 = vmatpush3.bf16.msra.mxu1 %v1216_v22 }
  0x15   :  { %1046 = vmatprep.subr.bf16.mxu1 %v1217_v26 }
  0x17   :  { %944 = vmatpush3.bf16.msra.mxu0 %v1184_v12 }
  0x18   :  { %945 = vmatprep.subr.bf16.mxu0 %v1185_v13  ;;  %1047 = vmatpush3.bf16.msra.mxu1 %v1217_v26 }
  0x19   :  { %1048 = vmatprep.subr.bf16.mxu1 %v1218_v27 }
  0x1b   :  { %946 = vmatpush3.bf16.msra.mxu0 %v1186_v14 }
  0x1c   :  { %947 = vmatprep.subr.bf16.mxu0 %v1187_v15  ;;  %1049 = vmatpush3.bf16.msra.mxu1 %v1218_v27 }
  0x1d   :  { %1050 = vmatprep.subr.bf16.mxu1 %v1219_v30 }
  0x1f   :  { %948 = vmatpush3.bf16.msra.mxu0 %v1188_v16 }
  0x20   :  { %1051 = vmatpush3.bf16.msra.mxu1 %v1219_v30 }
  0x21   :  { %1052 = vmatprep.subr.bf16.mxu1 %v1220_v31 }
  0x22   :  { %286 = vmatmul.mubr.bf16.vlgmr.msra.gmra.mrb[0].mxu0 %v1189_v19 }
  0x23   :  { %293 = vmatprep.mubr.bf16.mxu0 %v1192_v20 }
  0x24   :  { %1053 = vmatpush3.bf16.msra.mxu1 %v1220_v31 }
  0x25   :  { %1070 = vmatprep.subr.bf16.mxu1 %v1223_v34 }
  0x27   :  { %1055 = vmatmul.mubr.bf16.vlgmr.msra.gmra.mrb[0].mxu1 %v1222_v35 }
  0x28   :  { %1071 = vmatpush3.bf16.msra.mxu1 %v1223_v34  ;;  %1058 = vmatprep.mubr.bf16.mxu1 %v1225_v36 }
  0x29   :  { %1072 = vmatprep.subr.bf16.mxu1 %v1224_v37 }
  0x2a   :  { %294 = vmatmul.mubr.bf16.gmra.mrb[4].mxu0 %v1194_v24 }
  0x2b   :  { %301 = vmatprep.mubr.bf16.mxu0 %v1195_v25 }
  0x2c   :  { %1073 = vmatpush3.bf16.msra.mxu1 %v1224_v37 }
  0x2d   :  { %1074 = vmatprep.subr.bf16.mxu1 %v1227_v40 }
  0x2f   :  { %1059 = vmatmul.mubr.bf16.gmra.mrb[4].mxu1 %v1226_v41 }
  0x30   :  { %1075 = vmatpush3.bf16.msra.mxu1 %v1227_v40  ;;  %1062 = vmatprep.mubr.bf16.mxu1 %v1229_v48 }
  0x31   :  { %1076 = vmatprep.subr.bf16.mxu1 %v1228_v47 }
  0x32   :  { %302 = vmatmul.mubr.bf16.gmra.mrb[8].mxu0 %v1197_v28 }
  0x33   :  { %309 = vmatprep.mubr.bf16.mxu0 %v1198_v29 }
  0x34   :  { %1077 = vmatpush3.bf16.msra.mxu1 %v1228_v47 }
  0x35   :  { %1078 = vmatprep.subr.bf16.mxu1 %v1231_v50 }
  0x37   :  { %1063 = vmatmul.mubr.bf16.gmra.mrb[8].mxu1 %v1230_v49 }
  0x38   :  { %1079 = vmatpush3.bf16.msra.mxu1 %v1231_v50  ;;  %1066 = vmatprep.mubr.bf16.mxu1 %v1233_v52 }
  0x39   :  { %1080 = vmatprep.subr.bf16.mxu1 %v1232_v51 }
  0x3a   :  { %310 = vmatmul.mubr.bf16.gmra.mrb[12].mxu0 %v1200_v32 }
  0x3b   :  { %317 = vmatprep.mubr.bf16.mxu0 %v1201_v33 }
  0x3c   :  { %1081 = vmatpush3.bf16.msra.mxu1 %v1232_v51 }
  0x3d   :  { %1082 = vmatprep.subr.bf16.mxu1 %v1235_v54 }
  0x3f   :  { %1067 = vmatmul.mubr.bf16.gmra.mrb[12].mxu1 %v1234_v53 }
  0x40   :  { %1083 = vmatpush3.bf16.msra.mxu1 %v1235_v54 }
  0x41   :  { %1084 = vmatprep.subr.bf16.mxu1 %v1236_v55 }
  0x42   :  { %318 = vmatmul.mubr.bf16.gmra.mrb[16].mxu0 %v1203_v38 }
  0x43   :  { %325 = vmatprep.mubr.bf16.mxu0 %v1204_v39 }
  0x44   :  { %1085 = vmatpush3.bf16.msra.mxu1 %v1236_v55 }
  0x4a   :  { %326 = vmatmul.mubr.bf16.gmra.mrb[20].mxu0 %v1206_v42 }
  0x4b   :  { %333 = vmatprep.mubr.bf16.mxu0 %v1207_v43 }
  0x52   :  { %334 = vmatmul.mubr.bf16.gmra.mrb[24].mxu0 %v1209_v44 }
  0x53   :  { %341 = vmatprep.mubr.bf16.mxu0 %v1210_v45 }
  0x5a   :  { %342 = vmatmul.mubr.bf16.gmra.mrb[28].mxu0 %v1212_v46 }
  0xf5   :  { %v949_v56 = vpop.f32.mrb[0].mxu0 }
  0xf6   :  { %v950_v58 = vpop.f32.mrb[1].mxu0 }
  0xf7   :  { %v951_v59 = vadd.f32 %v950_v58, %v949_v56  ;;  %v952_v60 = vpop.f32.mrb[2].mxu0 }
  0xf8   :  { %v953_v61 = vpop.f32.mrb[3].mxu0 }
  0xf9   :  { %v288_v62 = vadd.f32 %v951_v59, %v1446_v57  ;;  %v954_v63 = vadd.f32 %v953_v61, %v952_v60 }
  0xfb   :  { %v291_v0 = vadd.f32 %v954_v63, %v1446_v57  ;;  %v350_v1 = vmax.f32 %v288_v62, 0.0 }
  0xfd   :  { %v351_v2 = vmax.f32 %v291_v0, 0.0  ;;  %v955_v3 = vpop.f32.mrb[4].mxu0 }
  0xfe   :  { %v956_v4 = vpop.f32.mrb[5].mxu0 }
  0xff   :  { %v957_v5 = vadd.f32 %v956_v4, %v955_v3  ;;  %v958_v6 = vpop.f32.mrb[6].mxu0  ;;  %v596_v7 = vpack.c.bf16 %v351_v2, %v350_v1 }
 0x100   :  { %v959_v8 = vpop.f32.mrb[7].mxu0 }
 0x101   :  { %v296_v9 = vadd.f32 %v957_v5, %v1446_v57  ;;  %v960_v10 = vadd.f32 %v959_v8, %v958_v6  ;;  %1086 = vmatprep.mubr.bf16.mxu1 %v596_v7 }
 0x103   :  { %v299_v11 = vadd.f32 %v960_v10, %v1446_v57  ;;  %v352_v12 = vmax.f32 %v296_v9, 0.0 }
 0x105   :  { %v353_v13 = vmax.f32 %v299_v11, 0.0  ;;  %v961_v14 = vpop.f32.mrb[8].mxu0 }
 0x106   :  { %v962_v15 = vpop.f32.mrb[9].mxu0 }
 0x107   :  { %v597_v16 = vpack.c.bf16 %v353_v13, %v352_v12  ;;  %v963_v17 = vadd.f32 %v962_v15, %v961_v14  ;;  %v964_v18 = vpop.f32.mrb[10].mxu0 }
 0x108   :  { %v965_v19 = vpop.f32.mrb[11].mxu0 }
 0x109   :  { %v304_v20 = vadd.f32 %v963_v17, %v1446_v57  ;;  %v966_v21 = vadd.f32 %v965_v19, %v964_v18  ;;  %1087 = vmatmul.mubr.bf16.vlgmr.msra.gmra.mrb[0].mxu1 %v597_v16  ;;  %v1237_v18 = vmov 0.0   ;;  %v905_v19 = vld [vmem:[%s1503_s5 + $0x2] ss:$0 sm:$0xff] }
 0x10a   :  { %1102 = vmatprep.subr.bf16.mxu0 %v1237_v18  ;;  %1118 = vmatprep.mubr.msk.bf16.mxu0 %vm1238_vm0, %v1237_v18 }
 0x10b   :  { %v307_v22 = vadd.f32 %v966_v21, %v1446_v57  ;;  %v354_v23 = vmax.f32 %v304_v20, 0.0  ;;  %v922_v20 = vld [vmem:[%s1503_s5 + $0x1] ss:$0 sm:$0xff] }
 0x10c   :  { %v1472_v21 = vadd.f32 %v922_v20, %v905_v19 }
 0x10d   :  { %v355_v24 = vmax.f32 %v307_v22, 0.0  ;;  %v967_v25 = vpop.f32.mrb[12].mxu0 }
 0x10e   :  { %v968_v26 = vpop.f32.mrb[13].mxu0 }
 0x10f   :  { %v969_v27 = vadd.f32 %v968_v26, %v967_v25  ;;  %v970_v28 = vpop.f32.mrb[14].mxu0  ;;  %v598_v29 = vpack.c.bf16 %v355_v24, %v354_v23 }
 0x110   :  { %v971_v30 = vpop.f32.mrb[15].mxu0 }
 0x111   :  { %v312_v31 = vadd.f32 %v969_v27, %v1446_v57  ;;  %v972_v32 = vadd.f32 %v971_v30, %v970_v28  ;;  %1090 = vmatprep.mubr.bf16.mxu1 %v598_v29 }
 0x113   :  { %v315_v33 = vadd.f32 %v972_v32, %v1446_v57  ;;  %v356_v34 = vmax.f32 %v312_v31, 0.0 }
 0x115   :  { %v357_v35 = vmax.f32 %v315_v33, 0.0  ;;  %v973_v36 = vpop.f32.mrb[16].mxu0 }
 0x116   :  { %v974_v37 = vpop.f32.mrb[17].mxu0 }
 0x117   :  { %v975_v38 = vadd.f32 %v974_v37, %v973_v36  ;;  %v976_v39 = vpop.f32.mrb[18].mxu0  ;;  %v599_v40 = vpack.c.bf16 %v357_v35, %v356_v34 }
 0x118   :  { %v977_v41 = vpop.f32.mrb[19].mxu0 }
 0x119   :  { %v320_v42 = vadd.f32 %v975_v38, %v1446_v57  ;;  %v978_v43 = vadd.f32 %v977_v41, %v976_v39  ;;  %1091 = vmatmul.mubr.bf16.gmra.mrb[4].mxu1 %v599_v40 }
 0x11b   :  { %v323_v44 = vadd.f32 %v978_v43, %v1446_v57  ;;  %v358_v45 = vmax.f32 %v320_v42, 0.0 }
 0x11d   :  { %v359_v46 = vmax.f32 %v323_v44, 0.0  ;;  %v979_v47 = vpop.f32.mrb[20].mxu0 }
 0x11e   :  { %v980_v48 = vpop.f32.mrb[21].mxu0 }
 0x11f   :  { %v981_v49 = vadd.f32 %v980_v48, %v979_v47  ;;  %v982_v50 = vpop.f32.mrb[22].mxu0  ;;  %v600_v51 = vpack.c.bf16 %v359_v46, %v358_v45 }
 0x120   :  { %v983_v52 = vpop.f32.mrb[23].mxu0 }
 0x121   :  { %v328_v53 = vadd.f32 %v981_v49, %v1446_v57  ;;  %v984_v54 = vadd.f32 %v983_v52, %v982_v50  ;;  %1094 = vmatprep.mubr.bf16.mxu1 %v600_v51 }
 0x123   :  { %v331_v55 = vadd.f32 %v984_v54, %v1446_v57  ;;  %v360_v56 = vmax.f32 %v328_v53, 0.0 }
 0x125   :  { %v361_v58 = vmax.f32 %v331_v55, 0.0  ;;  %v985_v59 = vpop.f32.mrb[24].mxu0 }
 0x126   :  { %v986_v60 = vpop.f32.mrb[25].mxu0 }
 0x127   :  { %v987_v61 = vadd.f32 %v986_v60, %v985_v59  ;;  %v988_v62 = vpop.f32.mrb[26].mxu0  ;;  %v601_v63 = vpack.c.bf16 %v361_v58, %v360_v56 }
 0x128   :  { %v989_v0 = vpop.f32.mrb[27].mxu0 }
 0x129   :  { %v336_v1 = vadd.f32 %v987_v61, %v1446_v57  ;;  %v990_v2 = vadd.f32 %v989_v0, %v988_v62  ;;  %1095 = vmatmul.mubr.bf16.gmra.mrb[8].mxu1 %v601_v63 }
 0x12b   :  { %v339_v3 = vadd.f32 %v990_v2, %v1446_v57  ;;  %v362_v4 = vmax.f32 %v336_v1, 0.0  ;;  %v802_v2 = vlaneseq }
 0x12d   :  { %v363_v5 = vmax.f32 %v339_v3, 0.0  ;;  %v991_v6 = vpop.f32.mrb[28].mxu0  ;;  %v808_v3 = vshrl.u32 %v802_v2, 7 }
 0x12e   :  { %v992_v7 = vpop.f32.mrb[29].mxu0 }
 0x12f   :  { %v993_v8 = vadd.f32 %v992_v7, %v991_v6  ;;  %v994_v9 = vpop.f32.mrb[30].mxu0  ;;  %v602_v10 = vpack.c.bf16 %v363_v5, %v362_v4  ;;  %v811_v5 = vadd.s32 1, %v808_v3 }
 0x130   :  { %v995_v11 = vpop.f32.mrb[31].mxu0 }
 0x131   :  { %v344_v12 = vadd.f32 %v993_v8, %v1446_v57  ;;  %v996_v13 = vadd.f32 %v995_v11, %v994_v9  ;;  %1098 = vmatprep.mubr.bf16.mxu1 %v602_v10 }
 0x133   :  { %v347_v14 = vadd.f32 %v996_v13, %v1446_v57  ;;  %v364_v15 = vmax.f32 %v344_v12, 0.0  ;;  %v803_v13 = vand.u32 127, %v802_v2 }
 0x135   :  { %v365_v16 = vmax.f32 %v347_v14, 0.0  ;;  %v809_v14 = vmul.u32 64, %v808_v3 }
 0x137   :  { %v603_v17 = vpack.c.bf16 %v365_v16, %v364_v15  ;;  %v812_v15 = vmul.u32 64, %v811_v5  ;;  %vm810_vm1 = vcmp.ge.s32.totalorder %v803_v13, %v809_v14 }
 0x139   :  { %1099 = vmatmul.mubr.bf16.gmra.mrb[12].mxu1 %v603_v17  ;;  %vm813_vm2 = vcmp.lt.s32.totalorder %v803_v13, %v812_v15 }
 0x13a   :  { %vm814_vm3 = vmand %vm810_vm1, %vm813_vm2 }
 0x13b   :  { %vm931_vm4 = vmpackc.low %vm814_vm3, %vm814_vm3 }
 0x1dc   :  { %v1088_v57 = vpop.f32.mrb[0].mxu1 }
 0x1dd   :  { %v1122_v22 = vadd.f32 %v1088_v57, %v905_v19  ;;  %v707_v23 = vpop.f32.mrb[1].mxu1 }
 0x1de   :  { %v1124_v24 = vadd.f32 %v905_v19, %v707_v23  ;;  %v1089_v25 = vpop.f32.mrb[2].mxu1  ;;  %v1239_v23 = vmov 1.0|1.0  }
 0x1df   :  { %v1123_v26 = vadd.f32 %v1122_v22, %v922_v20  ;;  %v1127_v27 = vadd.f32 %v1472_v21, %v1089_v25  ;;  %v710_v28 = vpop.f32.mrb[3].mxu1 }
 0x1e0   :  { %v1125_v29 = vadd.f32 %v1124_v24, %v922_v20  ;;  %v1129_v30 = vadd.f32 %v1472_v21, %v710_v28 }
 0x1e1   :  { %v788_v31 = vmax.f32 %v1123_v26, 0.0  ;;  %v789_v32 = vmax.f32 %v1127_v27, 0.0 }
 0x1e2   :  { %v786_v33 = vmax.f32 %v1125_v29, 0.0  ;;  %v787_v34 = vmax.f32 %v1129_v30, 0.0 }
 0x1e3   :  { %v820_v35 = vpack.c.bf16 %v789_v32, %v788_v31 }
 0x1e4   :  { %v819_v36 = vpack.c.bf16 %v787_v34, %v786_v33 }
 0x1e6   :  { %1103 = vmatpush3.bf16.msra.mxu0 %v819_v36 }
 0x1e7   :  { %1104 = vmatprep.subr.bf16.mxu0 %v1237_v18 }
 0x1ea   :  { %1105 = vmatpush3.bf16.msra.mxu0 %v820_v35 }
 0x1eb   :  { %1106 = vmatprep.subr.bf16.mxu0 %v1237_v18 }
 0x1ec   :  { %v1092_v37 = vpop.f32.mrb[4].mxu1 }
 0x1ed   :  { %v1131_v38 = vadd.f32 %v1472_v21, %v1092_v37  ;;  %v723_v39 = vpop.f32.mrb[5].mxu1 }
 0x1ee   :  { %v1133_v40 = vadd.f32 %v1472_v21, %v723_v39  ;;  %v1093_v41 = vpop.f32.mrb[6].mxu1 }
 0x1ef   :  { %v1135_v42 = vadd.f32 %v1472_v21, %v1093_v41  ;;  %v726_v43 = vpop.f32.mrb[7].mxu1  ;;  %v792_v45 = vmax.f32 %v1131_v38, 0.0 }
 0x1f0   :  { %v1137_v44 = vadd.f32 %v1472_v21, %v726_v43  ;;  %v790_v47 = vmax.f32 %v1133_v40, 0.0 }
 0x1f1   :  { %v793_v46 = vmax.f32 %v1135_v42, 0.0 }
 0x1f2   :  { %v791_v48 = vmax.f32 %v1137_v44, 0.0 }
 0x1f3   :  { %v822_v49 = vpack.c.bf16 %v793_v46, %v792_v45 }
 0x1f4   :  { %v821_v50 = vpack.c.bf16 %v791_v48, %v790_v47 }
 0x1f6   :  { %1107 = vmatpush3.bf16.msra.mxu0 %v821_v50 }
 0x1f7   :  { %1108 = vmatprep.subr.bf16.mxu0 %v1237_v18 }
 0x1fa   :  { %1109 = vmatpush3.bf16.msra.mxu0 %v822_v49 }
 0x1fb   :  { %1110 = vmatprep.subr.bf16.mxu0 %v1237_v18 }
 0x1fc   :  { %v1096_v51 = vpop.f32.mrb[8].mxu1 }
 0x1fd   :  { %v1139_v52 = vadd.f32 %v1472_v21, %v1096_v51  ;;  %v739_v53 = vpop.f32.mrb[9].mxu1 }
 0x1fe   :  { %v1141_v54 = vadd.f32 %v1472_v21, %v739_v53  ;;  %v1097_v55 = vpop.f32.mrb[10].mxu1 }
 0x1ff   :  { %v1143_v56 = vadd.f32 %v1472_v21, %v1097_v55  ;;  %v742_v58 = vpop.f32.mrb[11].mxu1  ;;  %v796_v60 = vmax.f32 %v1139_v52, 0.0 }
 0x200   :  { %v1145_v59 = vadd.f32 %v1472_v21, %v742_v58  ;;  %v794_v62 = vmax.f32 %v1141_v54, 0.0 }
 0x201   :  { %v797_v61 = vmax.f32 %v1143_v56, 0.0 }
 0x202   :  { %v795_v63 = vmax.f32 %v1145_v59, 0.0 }
 0x203   :  { %v824_v0 = vpack.c.bf16 %v797_v61, %v796_v60 }
 0x204   :  { %v823_v1 = vpack.c.bf16 %v795_v63, %v794_v62 }
 0x206   :  { %1111 = vmatpush3.bf16.msra.mxu0 %v823_v1 }
 0x207   :  { %1112 = vmatprep.subr.bf16.mxu0 %v1237_v18 }
 0x20a   :  { %1113 = vmatpush3.bf16.msra.mxu0 %v824_v0 }
 0x20b   :  { %1114 = vmatprep.subr.bf16.mxu0 %v1237_v18 }
 0x20c   :  { %v1100_v4 = vpop.f32.mrb[12].mxu1 }
 0x20d   :  { %v1147_v6 = vadd.f32 %v1472_v21, %v1100_v4  ;;  %v755_v7 = vpop.f32.mrb[13].mxu1 }
 0x20e   :  { %v1149_v8 = vadd.f32 %v1472_v21, %v755_v7  ;;  %v1101_v9 = vpop.f32.mrb[14].mxu1 }
 0x20f   :  { %v1151_v10 = vadd.f32 %v1472_v21, %v1101_v9  ;;  %v758_v11 = vpop.f32.mrb[15].mxu1  ;;  %v800_v16 = vmax.f32 %v1147_v6, 0.0 }
 0x210   :  { %v1153_v12 = vadd.f32 %v1472_v21, %v758_v11  ;;  %v798_v19 = vmax.f32 %v1149_v8, 0.0 }
 0x211   :  { %v801_v17 = vmax.f32 %v1151_v10, 0.0 }
 0x212   :  { %v799_v20 = vmax.f32 %v1153_v12, 0.0 }
 0x213   :  { %v826_v57 = vpack.c.bf16 %v801_v17, %v800_v16 }
 0x214   :  { %v825_v22 = vpack.c.bf16 %v799_v20, %v798_v19 }
 0x216   :  { %1115 = vmatpush3.bf16.msra.mxu0 %v825_v22 }
 0x217   :  { %1116 = vmatprep.subr.bf16.mxu0 %v1237_v18 }
 0x21a   :  { %1117 = vmatpush3.bf16.msra.mxu0 %v826_v57 }
 0x21d   :  { %1119 = vmatmul.mubr.msk.bf16.vlgmr.msra.gmra.mrb[32].mxu0 %vm931_vm4, %v1239_v23 }
 0x2f0   :  { %v861_v21 = vpop.f32.mrb[32].mxu0 }
 0x2f1   :  { %867 = vst [vmem:[%s1504_s6] sm:$0xff] %v861_v21  ;;  %v1120_v24 = vpop.f32.mrb[33].mxu0 }
 0x2f2   :  { %v864_v25 = vpop.f32.mrb[34].mxu0 }
 0x2f3   :  { %v1121_v26 = vpop.f32.mrb[35].mxu0 }

</bundles_post_ra>
